<compile_context>
chip_gen: v5e
topology: v5e:2x2
jax: 0.10.0
libtpu: 0.0.40
codegen_flags: <defaults>
</compile_context>

<pallas_src>
import functools

import jax
import jax.numpy as jnp
from jax.experimental import pallas as pl
from jax.experimental.pallas import tpu as pltpu

BN_EPS = 1e-5
NORM_EPS = 1e-12
_LANE = 128


def _round_up(x, m):
    return ((x + m - 1) // m) * m


def embed_kernel(x_ref, w1_ref, b1_ref, w2_ref, b2_ref, o_ref, *, nb):
    # x_ref: (nb, C_in, TP) -- channels on sublanes, pixels on lanes (lane-dense).
    w1 = w1_ref[...]          # (C_out, C_in)   BN-folded
    b1 = b1_ref[...]          # (C_out, 1)
    w2 = w2_ref[...]          # (C_out, C_out)
    b2 = b2_ref[...]          # (C_out, 1)

    # Small static unrolled loop over the images batched into this grid step.
    for b in range(nb):
        x = x_ref[b]          # (C_in, TP)

        # Conv2d #1 (1x1) with BatchNorm folded in:  y = W1' @ x + b1'
        y = jnp.dot(w1, x, preferred_element_type=jnp.float32,
                    precision=jax.lax.Precision.HIGHEST) + b1
        # ReLU
        y = jnp.maximum(y, 0.0)
        # Conv2d #2 (1x1)
        y = jnp.dot(w2, y, preferred_element_type=jnp.float32,
                    precision=jax.lax.Precision.HIGHEST) + b2

        # F.normalize(p=2, dim=channel): y * rsqrt(max(||y||^2, eps^2))
        sumsq = jnp.sum(y * y, axis=0, keepdims=True)            # (1, TP)
        inv = jax.lax.rsqrt(jnp.maximum(sumsq, NORM_EPS * NORM_EPS))
        o_ref[b] = (y * inv).astype(o_ref.dtype)


def embed_forward(x_nchw, params, *, target_tile_pixels=16384, out_dtype=None):
    """x_nchw: (N, C_in, H, W) float32. Returns (N, C_out, H, W)."""
    w1, b1, gamma, beta, mu, var, w2, b2 = params
    N, C_in, H, W = x_nchw.shape
    C_out = w1.shape[0]
    HW = H * W
    out_dtype = x_nchw.dtype if out_dtype is None else out_dtype

    # Channels-on-sublanes / pixels-on-lanes view: contiguous reshape only.
    x_cp = x_nchw.reshape(N, C_in, HW)

    # Fold inference BatchNorm into conv1:  scale = gamma / sqrt(var + eps)
    scale = (gamma * jax.lax.rsqrt(var + BN_EPS)).astype(jnp.float32)
    w1f = (w1.reshape(C_out, C_in) * scale[:, None]).astype(jnp.float32)
    b1f = ((b1 - mu) * scale + beta).reshape(C_out, 1).astype(jnp.float32)
    w2f = w2.reshape(C_out, C_out).astype(jnp.float32)
    b2f = b2.reshape(C_out, 1).astype(jnp.float32)

    # ---- tile / per-step batching selection (bytes-per-step amortization) ----
    in_itemsize = x_cp.dtype.itemsize
    out_itemsize = jnp.dtype(out_dtype).itemsize
    # Per-pixel VMEM footprint (per image): double-buffered in + out blocks plus
    # ~3x f32 intermediates inside the kernel body.
    bytes_per_pixel = (2 * C_in * in_itemsize + 2 * C_out * out_itemsize
                       + 3 * C_out * 4)
    VMEM_BUDGET = 40 << 20  # conservative across v5e / v6e / v7x (64 MiB physical)
    max_pixels = max(_LANE, (VMEM_BUDGET // bytes_per_pixel) // _LANE * _LANE)
    tile_target = min(_round_up(target_tile_pixels, _LANE), max_pixels)

    if HW >= tile_target:
        # Large feature maps: one image per step, big lane-dense pixel tiles.
        nb = 1
        tp = tile_target
    else:
        # Small maps: batch several images per grid step (full-extent pixel axis).
        tp = HW
        nb = max(1, min(N, tile_target // max(HW, 1), 16))

    grid_n = pl.cdiv(N, nb)
    grid_p = pl.cdiv(HW, tp)
    # v7x megacore: ensure >= 2 steps on a 'parallel' axis when possible.
    if grid_n * grid_p < 2:
        if nb > 1:
            nb = max(1, nb // 2)
        elif HW >= 2 * _LANE:
            tp = _round_up(pl.cdiv(HW, 2), _LANE)
        grid_n = pl.cdiv(N, nb)
        grid_p = pl.cdiv(HW, tp)
    grid = (grid_n, grid_p)

    const = lambda shape: pl.BlockSpec(shape, lambda n, i: (0, 0))

    P = N * HW
    flops = 2 * P * C_out * (C_in + C_out) + 4 * P * C_out
    bytes_accessed = (P * C_in * in_itemsize + P * C_out * out_itemsize
                      + 4 * (C_out * C_in + C_out * C_out + 2 * C_out))
    vmem_est = (nb * tp * bytes_per_pixel
                + 2 * 4 * (C_out * C_in + C_out * C_out + 2 * C_out))
    vmem_limit = int(min(max(vmem_est + (8 << 20), 16 << 20), 48 << 20))

    out_cp = pl.pallas_call(
        functools.partial(embed_kernel, nb=nb),
        out_shape=jax.ShapeDtypeStruct((N, C_out, HW), out_dtype),
        grid_spec=pltpu.PrefetchScalarGridSpec(
            num_scalar_prefetch=0,
            grid=grid,
            in_specs=[
                pl.BlockSpec((nb, C_in, tp), lambda n, i: (n, 0, i)),  # x tile
                # Constant index_map => not re-DMA'd across steps; default
                # double-buffering costs only ~2x their (tiny) size in VMEM.
                const((C_out, C_in)),   # BN-folded W1
                const((C_out, 1)),      # BN-folded b1
                const((C_out, C_out)),  # W2
                const((C_out, 1)),      # b2
            ],
            out_specs=pl.BlockSpec((nb, C_out, tp), lambda n, i: (n, 0, i)),
        ),
        compiler_params=pltpu.CompilerParams(
            dimension_semantics=("parallel", "parallel"),
            vmem_limit_bytes=vmem_limit),
        cost_estimate=pl.CostEstimate(
            flops=flops, transcendentals=P, bytes_accessed=bytes_accessed),
    )(x_cp, w1f, b1f, w2f, b2f)

    # (N, C_out, H*W) -> NCHW (free reshape, no transpose)
    return out_cp.reshape(N, C_out, H, W)


def make_params(key, dim_in, dim_out):
    """Deterministic synthetic parameters with the module's shapes."""
    ks = jax.random.split(key, 8)
    w1 = 0.1 * jax.random.normal(ks[0], (dim_out, dim_in, 1, 1), jnp.float32)
    b1 = 0.1 * jax.random.normal(ks[1], (dim_out,), jnp.float32)
    # SyncBatchNorm(dim_in) params; dim_in == dim_out required by the module.
    gamma = 1.0 + 0.05 * jax.random.normal(ks[2], (dim_in,), jnp.float32)
    beta = 0.05 * jax.random.normal(ks[3], (dim_in,), jnp.float32)
    mu = 0.1 * jax.random.normal(ks[4], (dim_in,), jnp.float32)
    var = jnp.abs(jax.random.normal(ks[5], (dim_in,), jnp.float32)) + 0.5
    w2 = 0.1 * jax.random.normal(ks[6], (dim_out, dim_out, 1, 1), jnp.float32)
    b2 = 0.1 * jax.random.normal(ks[7], (dim_out,), jnp.float32)
    return (w1, b1, gamma, beta, mu, var, w2, b2)


def reference_forward(x_nchw, params):
    """Plain-JAX reference (mirrors the PyTorch eval-mode forward, un-folded BN)."""
    w1, b1, gamma, beta, mu, var, w2, b2 = params
    N, C_in, H, W = x_nchw.shape
    C_out = w1.shape[0]
    hi = jax.lax.Precision.HIGHEST
    xp = jnp.transpose(x_nchw, (0, 2, 3, 1)).reshape(-1, C_in)
    y = jnp.dot(xp, w1.reshape(C_out, C_in).T, precision=hi) + b1
    y = (y - mu) * jax.lax.rsqrt(var + BN_EPS) * gamma + beta
    y = jnp.maximum(y, 0.0)
    y = jnp.dot(y, w2.reshape(C_out, C_out).T, precision=hi) + b2
    n = jnp.sqrt(jnp.sum(y * y, axis=-1, keepdims=True))
    y = y / jnp.maximum(n, NORM_EPS)
    return jnp.transpose(y.reshape(N, H, W, C_out), (0, 3, 1, 2))


if __name__ == "__main__":
    key = jax.random.PRNGKey(0)
    # Small shapes: dim_in == dim_out == 32 (only shape-consistent config of the
    # original module), batch=2, 16x16 spatial map.
    dim_in, dim_out = 32, 32
    N, H, W = 2, 16, 16

    kx, kp = jax.random.split(key)
    x = jax.random.normal(kx, (N, dim_in, H, W), jnp.float32)
    params = make_params(kp, dim_in, dim_out)

    out = jax.block_until_ready(embed_forward(x, params))
    ref = jax.block_until_ready(reference_forward(x, params))

    assert out.shape == (N, dim_out, H, W)
    assert jnp.allclose(out, ref, atol=1e-4, rtol=1e-4), "mismatch vs reference"
    # Sanity: per-pixel channel vectors are unit L2 norm.
    norms = jnp.sqrt(jnp.sum(out * out, axis=1))
    assert jnp.allclose(norms, 1.0, atol=1e-4)

    print("KERNEL_OK")
</pallas_src>

<mosaic_0001>
module attributes {stable_mosaic.version = 11 : i64} {
  func.func @embed_kernel(%arg0: i32, %arg1: i32, %arg2: memref<1x32x256xf32, #tpu.memory_space<vmem>>, %arg3: memref<32x32xf32, #tpu.memory_space<vmem>>, %arg4: memref<32x1xf32, #tpu.memory_space<vmem>>, %arg5: memref<32x32xf32, #tpu.memory_space<vmem>>, %arg6: memref<32x1xf32, #tpu.memory_space<vmem>>, %arg7: memref<1x32x256xf32, #tpu.memory_space<vmem>>) attributes {dimension_semantics = [#tpu.dimension_semantics<parallel>, #tpu.dimension_semantics<parallel>], iteration_bounds = array<i64: 2, 1>, scalar_prefetch = 0 : i64, scratch_operands = 0 : i64, tpu.core_type = #tpu.core_type<tc>, window_params = [{transform_indices = @transform_0, window_bounds = array<i64: 1, 32, 256>}, {pipeline_mode = #tpu.pipeline_mode<synchronous>, transform_indices = @transform_1, window_bounds = array<i64: 32, 32>}, {pipeline_mode = #tpu.pipeline_mode<synchronous>, transform_indices = @transform_2, window_bounds = array<i64: 32, 1>}, {pipeline_mode = #tpu.pipeline_mode<synchronous>, transform_indices = @transform_3, window_bounds = array<i64: 32, 32>}, {pipeline_mode = #tpu.pipeline_mode<synchronous>, transform_indices = @transform_4, window_bounds = array<i64: 32, 1>}, {transform_indices = @transform_5, window_bounds = array<i64: 1, 32, 256>}]} {
    %c0 = arith.constant 0 : index
    %c0_0 = arith.constant 0 : index
    %0 = vector.load %arg3[%c0, %c0_0] : memref<32x32xf32, #tpu.memory_space<vmem>>, vector<32x32xf32>
    %c0_1 = arith.constant 0 : index
    %c0_2 = arith.constant 0 : index
    %1 = vector.load %arg4[%c0_1, %c0_2] : memref<32x1xf32, #tpu.memory_space<vmem>>, vector<32x1xf32>
    %c0_3 = arith.constant 0 : index
    %c0_4 = arith.constant 0 : index
    %2 = vector.load %arg5[%c0_3, %c0_4] : memref<32x32xf32, #tpu.memory_space<vmem>>, vector<32x32xf32>
    %c0_5 = arith.constant 0 : index
    %c0_6 = arith.constant 0 : index
    %3 = vector.load %arg6[%c0_5, %c0_6] : memref<32x1xf32, #tpu.memory_space<vmem>>, vector<32x1xf32>
    %c0_7 = arith.constant 0 : index
    %c0_8 = arith.constant 0 : index
    %c0_9 = arith.constant 0 : index
    %4 = vector.load %arg2[%c0_7, %c0_8, %c0_9] : memref<1x32x256xf32, #tpu.memory_space<vmem>>, vector<1x32x256xf32>
    %5 = vector.shape_cast %4 : vector<1x32x256xf32> to vector<32x256xf32>
    %cst = arith.constant dense<0.000000e+00> : vector<32x256xf32>
    %6 = tpu.matmul %0, %5, %cst {dimension_numbers = #tpu.dot_dimension_numbers<[1], [0], [0], [1], [0, 0, 1, 1], [], []>, precision = #tpu.contract_precision<fp32>} : vector<32x32xf32>, vector<32x256xf32>, vector<32x256xf32> -> vector<32x256xf32>
    %7 = vector.broadcast %1 : vector<32x1xf32> to vector<32x256xf32>
    %8 = arith.addf %6, %7 : vector<32x256xf32>
    %cst_10 = arith.constant 0.000000e+00 : f32
    %9 = vector.broadcast %cst_10 : f32 to vector<32x256xf32>
    %10 = arith.maximumf %8, %9 : vector<32x256xf32>
    %cst_11 = arith.constant dense<0.000000e+00> : vector<32x256xf32>
    %11 = tpu.matmul %2, %10, %cst_11 {dimension_numbers = #tpu.dot_dimension_numbers<[1], [0], [0], [1], [0, 0, 1, 1], [], []>, precision = #tpu.contract_precision<fp32>} : vector<32x32xf32>, vector<32x256xf32>, vector<32x256xf32> -> vector<32x256xf32>
    %12 = vector.broadcast %3 : vector<32x1xf32> to vector<32x256xf32>
    %13 = arith.addf %11, %12 : vector<32x256xf32>
    %14 = arith.mulf %13, %13 : vector<32x256xf32>
    %cst_12 = arith.constant dense<0.000000e+00> : vector<256xf32>
    %15 = vector.multi_reduction <add>, %14, %cst_12 [0] : vector<32x256xf32> to vector<256xf32>
    %16 = vector.shape_cast %15 : vector<256xf32> to vector<1x256xf32>
    %cst_13 = arith.constant 1.000000e-24 : f32
    %17 = vector.broadcast %cst_13 : f32 to vector<1x256xf32>
    %18 = arith.maximumf %16, %17 : vector<1x256xf32>
    %19 = math.rsqrt %18 : vector<1x256xf32>
    %20 = vector.broadcast %19 : vector<1x256xf32> to vector<32x256xf32>
    %21 = arith.mulf %13, %20 : vector<32x256xf32>
    %c0_14 = arith.constant 0 : index
    %c0_15 = arith.constant 0 : index
    %c0_16 = arith.constant 0 : index
    %22 = vector.load %arg7[%c0_14, %c0_15, %c0_16] : memref<1x32x256xf32, #tpu.memory_space<vmem>>, vector<1x32x256xf32>
    %23 = vector.shape_cast %22 : vector<1x32x256xf32> to vector<32x256xf32>
    %24 = vector.shape_cast %21 : vector<32x256xf32> to vector<1x32x256xf32>
    tpu.vector_store %arg7[%c0_14, %c0_15, %c0_16], %24 {strides = array<i32>} : memref<1x32x256xf32, #tpu.memory_space<vmem>>, vector<1x32x256xf32>,
    return
  }
  func.func @transform_0(%arg0: i32, %arg1: i32) -> (i32, i32, i32) {
    %c0_i32 = arith.constant 0 : i32
    %c0_i32_0 = arith.constant 0 : i32
    return %arg0, %c0_i32, %arg1 : i32, i32, i32
  }
  func.func @transform_1(%arg0: i32, %arg1: i32) -> (i32, i32) {
    %c0_i32 = arith.constant 0 : i32
    %c0_i32_0 = arith.constant 0 : i32
    %c0_i32_1 = arith.constant 0 : i32
    return %c0_i32, %c0_i32_0 : i32, i32
  }
  func.func @transform_2(%arg0: i32, %arg1: i32) -> (i32, i32) {
    %c0_i32 = arith.constant 0 : i32
    %c0_i32_0 = arith.constant 0 : i32
    %c0_i32_1 = arith.constant 0 : i32
    return %c0_i32, %c0_i32_0 : i32, i32
  }
  func.func @transform_3(%arg0: i32, %arg1: i32) -> (i32, i32) {
    %c0_i32 = arith.constant 0 : i32
    %c0_i32_0 = arith.constant 0 : i32
    %c0_i32_1 = arith.constant 0 : i32
    return %c0_i32, %c0_i32_0 : i32, i32
  }
  func.func @transform_4(%arg0: i32, %arg1: i32) -> (i32, i32) {
    %c0_i32 = arith.constant 0 : i32
    %c0_i32_0 = arith.constant 0 : i32
    %c0_i32_1 = arith.constant 0 : i32
    return %c0_i32, %c0_i32_0 : i32, i32
  }
  func.func @transform_5(%arg0: i32, %arg1: i32) -> (i32, i32, i32) {
    %c0_i32 = arith.constant 0 : i32
    %c0_i32_0 = arith.constant 0 : i32
    return %arg0, %c0_i32, %arg1 : i32, i32, i32
  }
}

</mosaic_0001>

<bundles_post_ra>
// kernel: tpu_custom_call.1
= control target key start
LH: loop header
LB: loop body
LE: loop exit
PB: predicated region body
PF: predicated region fallthrough
CT: control target
= control target key end

     0   :  { %10 = vsyncpa [#allocation3], 0  ;;  %s2457_s0 = inlined_call_operand.hbm [shape: f32[2,32,256], index: 0, kind: input, shape index: {}]   ;;  %s2458_s1 = inlined_call_operand.vmem [shape: f32[32,32], index: 1, kind: input, shape index: {}]   ;;  %s2459_s2 = inlined_call_operand.vmem [shape: f32[32,1], index: 2, kind: input, shape index: {}]   ;;  %s2460_s3 = inlined_call_operand.vmem [shape: f32[32,32], index: 3, kind: input, shape index: {}]   ;;  %s2461_s4 = inlined_call_operand.vmem [shape: f32[32,1], index: 4, kind: input, shape index: {}]   ;;  %s2462_s5 = inlined_call_operand.hbm [shape: f32[2,32,256], index: 5, kind: output, shape index: {}]  }
   0x1   :  { %12 = vsyncpa [#allocation3 + $0x1], 0 }
   0x2   :  { %13 = vsyncpa [#allocation4], 0 }
   0x3   :  { %15 = vsyncpa [#allocation4 + $0x1], 0  ;;  %s1883_s18 = smov 0   ;;  %s1885_s19 = smov 0  }
   0x4   :  { %s1887_s20 = smov 0   ;;  %s1889_s21 = smov 0  }
   0x5   :  { %s1891_s22 = smov 0   ;;  %s1893_s23 = smov 0  }
   0x6 LB: > { %s1643_s24 = sadd.s32 4294967295, %s1846_s23   ;;  %s1644_s25 = sadd.s32 4294967294, %s1846_s23   ;;  %s1846_s23 = sphi %s1893_s23, %s21_s23   ;;  %s1842_s22 = sphi %s1891_s22, %s2471_s22   ;;  %s1838_s21 = sphi %s1889_s21, %s2470_s21   ;;  %s1834_s20 = sphi %s1887_s20, %s2469_s20   ;;  %s1830_s19 = sphi %s1885_s19, %s2468_s19   ;;  %s1826_s18 = sphi %s1883_s18, %s2467_s18  }
   0x7   : > { %s33_s26 = sadd.s32 1, %s1842_s22  ;;  %s42_s27 = sadd.s32 1, %s1834_s20 }
   0x8   : > { %p35_p0 = scmp.ge.s32.totalorder %s33_s26, 2  ;;  %p49_p1 = scmp.ne.s32.totalorder %s1834_s20, %s1830_s19 }
   0x9   : > { %p50_p2 = scmp.eq.s32.totalorder %s1846_s23, 0  ;;  %p55_p3 = scmp.ne.s32.totalorder %s1830_s19, %s1826_s18 }
   0xa   : > { %s2473_s26 = smov (%p35_p0, %s33_s26), 0  ;;  %p56_p5 = scmp.eq.s32.totalorder %s1643_s24, 0 }
   0xb   : > { %p1924_p4 = por %p50_p2, %p49_p1  ;;  %s37_s29 = ssub.s32 %s1842_s22, %s2473_s26 }
   0xc   : > { %p165_p6 = scmp.eq.s32.totalorder %s1643_s24, 1  ;;  %p40_p7 = scmp.eq.s32.totalorder %s37_s29, 0 }
   0xd   : > { %p1930_p8 = por %p56_p5, %p55_p3  ;;  %p171_p10 = scmp.eq.s32.totalorder %s1644_s25, 1 }
   0xe   : > { %p1934_p9 = por %p165_p6, %p49_p1  ;;  %p1646_p12 = scmp.ge.s32.totalorder %s1846_s23, 2 }
   0xf   : > { %s1939_s7 = scalar_select %p40_p7, %s1834_s20, %s42_s27  }
  0x10   : > { %p1941_p11 = por %p171_p10, %p55_p3  ;;  %p1672_p13 = scmp.lt.s32.totalorder %s1846_s23, 2 }
  0x11   : > { %s203_s9 = sand.u32 1, %s1834_s20   ;;  %s1658_s11 = sshll.u32 %s1842_s22, 6 }
  0x12   : > { %s1647_s10 = sshll.u32 %s203_s9, 6  ;;  %s214_s14 = scalar_lea.hbm %s2457_s0, %s1658_s11 }
  0x13   : > { %s207_s15 = scalar_lea.vmem [#allocation2], %s1647_s10  ;;  %s215_s17 = sshll.u32 %s214_s14, 4  ;;  %s216_s17 = int_to_ptr.hbm [resolvable:$true] %s215_s17 }
  0x14   : > { %s217_s16 = sshll.u32 %s207_s15, 4  ;;  %p1665_p0 = pnand %p1672_p13, %p1924_p4  ;;  %s218_s16 = int_to_ptr.vmem [resolvable:$true] %s217_s16 }
  0x15   : > { %p1650_p1 = scmp.ge.s32.totalorder %s1846_s23, 1  ;;  %s204_s24 = scalar_lea.sflag [#allocation3], %s203_s9 }
  0x16   : > { %s1848_s25 = smov 256   ;;  %s1849_s27 = smov 16  }
  0x17   : > { %1667 = dma.hbm_to_vmem [thread:$0]  (!%p1665_p0), %s216_s17, 1024, %s218_s16, %s204_s24, %s1848_s25, %s1848_s25, %s1849_s27  }
  0x18   : > { %p225_p2 = scmp.lt.s32.totalorder %s1846_s23, 3 }
  0x1a   : > { %p226_p3 = pnand %p1650_p1, %p225_p2 }
  0x1b   : > { %s1957_s29 = sand.u32 (!%p226_p3), 1, %s1830_s19  }
  0x1c   : > { %229 = sbr.rel (%p226_p3) target bundleno = 526 (0x20e), region = 40  ;;  %s1651_s10 = sshll.u32 (!%p226_p3), %s1957_s29, 6 }
  0x1d   : > { %s232_s11 = scalar_lea.sflag (!%p226_p3), [#allocation3], %s1957_s29  ;;  %s1963_s28 = scalar_lea.vmem (!%p226_p3), [#allocation2], %s1651_s10 }
  0x21   : > { %1817 = dma.done.wait (%p1930_p8), %s232_s11, 1024  }
  0x22   : > { %1819 = vsyncadd (%p1930_p8), %s232_s11, 4294966272  ;;  %v1850_v0 = vmov 0   ;;  %vm309_vm0 = vcmask 261120   ;;  %v287_v1 = vld [vmem:[%s1963_s28 + $0x30] sm:$0xff]  ;;  %v285_v2 = vld [vmem:[%s1963_s28 + $0x20] sm:$0xff]  ;;  %s2408_s16 = scalar_lea.vmem [#allocation5], %s1651_s10 }
  0x23   : > { %1728 = vset.pattern.permute.xlu1 %v1850_v0  ;;  %1727 = vset.pattern.permute.xlu0 %v1850_v0  ;;  %v283_v3 = vld [vmem:[%s1963_s28 + $0x10] sm:$0xff]  ;;  %v1972_v4 = vand.u32 4294901760, %v287_v1  ;;  %v1974_v5 = vand.u32 4294901760, %v285_v2  ;;  %v281_v7 = vld [vmem:[%s1963_s28] sm:$0xff]  ;;  %v270_v9 = vld [vmem:[%s2459_s2 + $0x8] sm:$0xff]  ;;  %s1659_s10 = sshll.u32 %s1838_s21, 6 }
  0x24   : > { %1729 = vset.pattern.permute.xlu2 %v1850_v0  ;;  %v1976_v6 = vand.u32 4294901760, %v283_v3  ;;  %v265_v8 = vld [vmem:[%s2458_s1] sm:$0xff]  ;;  %v1985_v10 = vand.u32 4294901760, %v281_v7  ;;  %296 = vperm.xlu1 %1728, %v270_v9   ;;  %v266_v12 = vld [vmem:[%s2458_s1 + $0x8] sm:$0xff]  ;;  %v267_v13 = vld [vmem:[%s2458_s1 + $0x10] sm:$0xff]  ;;  %s1552_s25 = scalar_lea.hbm %s2462_s5, %s1659_s10  ;;  %s1553_s27 = sshll.u32 %s2408_s16, 4  ;;  %s1554_s27 = int_to_ptr.vmem [resolvable:$true] %s1553_s27 }
  0x25   : > { %v311_v11 = vsel %vm309_vm0, %v265_v8, 0  ;;  %335 = vmatpush.msra.mxu0 %v1972_v4  ;;  %v1996_v14 = vsub.f32 %v287_v1, %v1972_v4  ;;  %v1999_v15 = vsub.f32 %v285_v2, %v1974_v5  ;;  %486 = vmatpush.msra.mxu3 %v1972_v4  ;;  %v272_v18 = vld [vmem:[%s2459_s2 + $0x18] sm:$0xff]  ;;  %v314_v20 = vsel %vm309_vm0, %v266_v12, 0  ;;  %v269_v32 = vld [vmem:[%s2459_s2] sm:$0xff]  ;;  %v286_v36 = vld [vmem:[%s1963_s28 + $0x28] sm:$0xff]  ;;  %s1555_s11 = sshll.u32 %s1552_s25, 4  ;;  %s1556_s11 = int_to_ptr.hbm [resolvable:$true] %s1555_s11 }
  0x26   : > { %v2003_v16 = vsub.f32 %v283_v3, %v1976_v6  ;;  %v2005_v17 = vand.u32 4294901760, %v311_v11  ;;  %v2011_v19 = vsub.f32 %v281_v7, %v1985_v10  ;;  %v317_v21 = vsel %vm309_vm0, %v267_v13, 0  ;;  %306 = vperm.xlu0 %1727, %v272_v18   ;;  %v288_v35 = vld [vmem:[%s1963_s28 + $0x38] sm:$0xff]  ;;  %v282_v43 = vld [vmem:[%s1963_s28 + $0x8] sm:$0xff]  ;;  %v271_v54 = vld [vmem:[%s2459_s2 + $0x10] sm:$0xff]  ;;  %s1539_s21 = scalar_lea.sflag [#allocation4], %s1957_s29 }
  0x27   : > { %442 = vmatpush.msra.mxu2 %v1996_v14  ;;  %337 = vmatpush.msra.mxu0 %v1974_v5  ;;  %v389_v22 = vand.u32 4294901760, %v1996_v14  ;;  %v395_v24 = vand.u32 4294901760, %v1999_v15  ;;  %v2025_v27 = vand.u32 4294901760, %v314_v20  ;;  %v2044_v34 = vand.u32 4294901760, %v317_v21  ;;  %v284_v37 = vld [vmem:[%s1963_s28 + $0x18] sm:$0xff]  ;;  %s1778_s30 = sshra.s32 %s1556_s11, 4  ;;  %s1779_s30 = int_to_ptr.hbm [resolvable:$true] %s1778_s30 }
  0x28   : > { %v2019_v23 = vsub.f32 %v311_v11, %v2005_v17  ;;  %v401_v25 = vand.u32 4294901760, %v2003_v16  ;;  %488 = vmatpush.msra.mxu3 %v1974_v5  ;;  %v407_v26 = vand.u32 4294901760, %v2011_v19  ;;  %v268_v42 = vld [vmem:[%s2458_s1 + $0x18] sm:$0xff]  ;;  %v2067_v47 = vand.u32 4294901760, %v288_v35  ;;  %s1780_s9 = scalar_lea.hbm %s1779_s30, 64  ;;  %s1784_s13 = scalar_lea.hbm %s2462_s5, 128 }
  0x29   : > { %445 = vmatpush.msra.mxu2 %v1999_v15  ;;  %339 = vmatpush.msra.mxu0 %v1976_v6  ;;  %v390_v28 = vsub.f32 %v1996_v14, %v389_v22  ;;  %v396_v30 = vsub.f32 %v1999_v15, %v395_v24  ;;  %v2042_v33 = vsub.f32 %v314_v20, %v2025_v27  ;;  %v2069_v48 = vand.u32 4294901760, %v286_v36  ;;  %p1781_p4 = scmp.ne.s32.totalorder %s1779_s30, %s1780_s9  ;;  %p1785_p7 = scmp.lt.s32.totalorder %s1779_s30, %s2462_s5 }
  0x2a   : > { %v2031_v29 = vand.u32 4294901760, %v2019_v23  ;;  %v402_v31 = vsub.f32 %v2003_v16, %v401_v25  ;;  %490 = vmatpush.msra.mxu3 %v1976_v6  ;;  %v408_v41 = vsub.f32 %v2011_v19, %v407_v26  ;;  %v2071_v49 = vand.u32 4294901760, %v284_v37  ;;  %p1786_p8 = scmp.lt.s32.totalorder %s1784_s13, %s1780_s9 }
  0x2b   : > { %448 = vmatpush.msra.mxu2 %v2003_v16  ;;  %341 = vmatpush.msra.mxu0 %v1985_v10  ;;  %v391_v38 = vand.u32 4294901760, %v390_v28  ;;  %v397_v40 = vand.u32 4294901760, %v396_v30  ;;  %v2062_v45 = vand.u32 4294901760, %v2042_v33  ;;  %v2078_v51 = vsub.f32 %v317_v21, %v2044_v34  ;;  %p1782_p5 = pnand %p1781_p4, %p1934_p9 }
  0x2c   : > { %v345_v39 = vsub.f32 %v2019_v23, %v2031_v29  ;;  %492 = vmatpush.msra.mxu3 %v1985_v10  ;;  %v403_v44 = vand.u32 4294901760, %v402_v31  ;;  %291 = vperm.xlu1 %1728, %v269_v32   ;;  %v320_v52 = vsel %vm309_vm0, %v268_v42, 0  ;;  %v2081_v53 = vand.u32 4294901760, %v282_v43  ;;  %p1787_p10 = por %p1786_p8, %p1785_p7 }
  0x2d   : > { %392 = vmatpush.msra.mxu1 %v391_v38  ;;  %451 = vmatpush.msra.mxu2 %v2011_v19  ;;  %v353_v50 = vsub.f32 %v2042_v33, %v2062_v45  ;;  %v409_v55 = vand.u32 4294901760, %v408_v41  ;;  %v666_v56 = vsub.f32 %v288_v35, %v2067_v47  ;;  %v672_v57 = vsub.f32 %v286_v36, %v2069_v48  ;;  %v280_v19 = vld [vmem:[%s2461_s4 + $0x18] sm:$0xff]  ;;  %p1783_p6 = pneg %p1782_p5 }
  0x2e   : > { %v2065_v46 = vand.u32 4294901760, %v345_v39  ;;  %454 = vmatmul.f32.vlgmr.msra.gmra.mxu2 %v2019_v23  ;;  %496 = vmatmul.f32.vlgmr.msra.gmra.mxu3 %v2031_v29  ;;  %v678_v58 = vsub.f32 %v284_v37, %v2071_v49  ;;  %v684_v59 = vsub.f32 %v282_v43, %v2081_v53  ;;  %v2093_v63 = vand.u32 4294901760, %v2078_v51 }
  0x2f   : > { %398 = vmatpush.msra.mxu1 %v397_v40  ;;  %533 = vmatpush.msrb.mxu0 %v389_v22  ;;  %v667_v60 = vand.u32 4294901760, %v666_v56  ;;  %v673_v61 = vand.u32 4294901760, %v672_v57  ;;  %v2095_v0 = vand.u32 4294901760, %v320_v52  ;;  %v2098_v2 = vand.u32 4294901760, %v353_v50  ;;  %p1788_p13 = pnand %p1787_p10, %p1783_p6 }
  0x30   : > { %347 = vmatmul.f32.vlgmr.msra.gmra.mxu0 %v2065_v46  ;;  %613 = vmatpush.msrb.mxu2 %v2067_v47  ;;  %v679_v62 = vand.u32 4294901760, %v678_v58  ;;  %v685_v1 = vand.u32 4294901760, %v684_v59  ;;  %v361_v13 = vsub.f32 %v2078_v51, %v2093_v63 }
  0x31   : > { %404 = vmatpush.msra.mxu1 %v403_v44  ;;  %301 = vperm.xlu0 %1727, %v271_v54   ;;  %v668_v3 = vsub.f32 %v666_v56, %v667_v60  ;;  %v674_v7 = vsub.f32 %v672_v57, %v673_v61  ;;  %v2111_v14 = vsub.f32 %v320_v52, %v2095_v0 }
  0x32   : > { %537 = vmatpush.msrb.mxu0 %v395_v24  ;;  %615 = vmatpush.msrb.mxu2 %v2069_v48  ;;  %v680_v8 = vsub.f32 %v678_v58, %v679_v62  ;;  %v686_v12 = vsub.f32 %v684_v59, %v685_v1  ;;  %v362_v16 = vand.u32 4294901760, %v361_v13 }
  0x33   : > { %410 = vmatpush.msra.mxu1 %v409_v55  ;;  %v669_v9 = vand.u32 4294901760, %v668_v3  ;;  %v675_v11 = vand.u32 4294901760, %v674_v7  ;;  %v2118_v18 = vand.u32 4294901760, %v2111_v14 }
  0x34   : > { %412 = vmatmul.f32.vlgmr.msra.gmra.mxu1 %v2005_v17  ;;  %541 = vmatpush.msrb.mxu0 %v401_v25  ;;  %v681_v15 = vand.u32 4294901760, %v680_v8 }
  0x35   : > { %617 = vmatpush.msrb.mxu2 %v2071_v49  ;;  %576 = vmatpush.msrb.mxu1 %v1972_v4  ;;  %v687_v4 = vand.u32 4294901760, %v686_v12 }
  0x36   : > { %459 = vmatmul.f32.gmra.mxu2 %v2042_v33  ;;  %502 = vmatmul.f32.gmra.mxu3 %v2062_v45 }
  0x37   : > { %670 = vmatpush.msrb.mxu3 %v669_v9  ;;  %545 = vmatpush.msrb.mxu0 %v407_v26 }
  0x38   : > { %355 = vmatmul.f32.gmra.mxu0 %v2098_v2  ;;  %619 = vmatpush.msrb.mxu2 %v2081_v53 }
  0x39   : > { %676 = vmatpush.msrb.mxu3 %v675_v11  ;;  %578 = vmatpush.msrb.mxu1 %v1974_v5  ;;  %v369_v5 = vsub.f32 %v2111_v14, %v2118_v18 }
  0x3a   : > { %720 = vmatpush.msra.mxu0 %v666_v56  ;;  %811 = vmatpush.msra.mxu2 %v667_v60 }
  0x3b   : > { %682 = vmatpush.msrb.mxu3 %v681_v15  ;;  %580 = vmatpush.msrb.mxu1 %v1976_v6  ;;  %v370_v6 = vand.u32 4294901760, %v369_v5 }
  0x3c   : > { %416 = vmatmul.f32.gmra.mxu1 %v2025_v27  ;;  %723 = vmatpush.msra.mxu0 %v672_v57 }
  0x3d   : > { %688 = vmatpush.msrb.mxu3 %v687_v4  ;;  %582 = vmatpush.msrb.mxu1 %v1985_v10  ;;  %v279_v10 = vld [vmem:[%s2461_s4 + $0x10] sm:$0xff] }
  0x3e   : > { %464 = vmatmul.f32.gmra.mxu2 %v2078_v51  ;;  %508 = vmatmul.f32.gmra.mxu3 %v2093_v63 }
  0x3f   : > { %815 = vmatpush.msra.mxu2 %v673_v61  ;;  %726 = vmatpush.msra.mxu0 %v678_v58  ;;  %v273_v58 = vld [vmem:[%s2460_s3] sm:$0xff] }
  0x40   : > { %363 = vmatmul.f32.gmra.mxu0 %v362_v16  ;;  %854 = vmatpush.msra.mxu3 %v2067_v47 }
  0x41   : > { %764 = vmatpush.msra.mxu1 %v2067_v47  ;;  %819 = vmatpush.msra.mxu2 %v679_v62 }
  0x42   : > { %729 = vmatpush.msra.mxu0 %v684_v59  ;;  %856 = vmatpush.msra.mxu3 %v2069_v48 }
  0x43   : > { %766 = vmatpush.msra.mxu1 %v2069_v48  ;;  %823 = vmatpush.msra.mxu2 %v685_v1  ;;  %v907_v1 = vsel %vm309_vm0, %v273_v58, 0 }
  0x44   : > { %420 = vmatmul.f32.gmra.mxu1 %v2044_v34  ;;  %858 = vmatpush.msra.mxu3 %v2071_v49  ;;  %v2203_v13 = vand.u32 4294901760, %v907_v1 }
  0x45   : > { %768 = vmatpush.msra.mxu1 %v2071_v49  ;;  %898 = vperm.xlu0 %1727, %v279_v10  }
  0x46   : > { %469 = vmatmul.f32.gmra.mxu2 %v2111_v14  ;;  %514 = vmatmul.f32.gmra.mxu3 %v2118_v18 }
  0x47   : > { %860 = vmatpush.msra.mxu3 %v2081_v53  ;;  %770 = vmatpush.msra.mxu1 %v2081_v53 }
  0x48   : > { %371 = vmatmul.f32.gmra.mxu0 %v370_v6  ;;  %903 = vperm.xlu1 %1728, %v280_v19  }
  0x4c   : > { %424 = vmatmul.f32.gmra.mxu1 %v2095_v0 }
  0x4e   : > { %625 = vmatmul.f32.vlgmr.msrb.gmra.mxu2 %v2065_v46  ;;  %690 = vmatmul.f32.vlgmr.msrb.gmra.mxu3 %v2005_v17 }
  0x50   : > { %547 = vmatmul.f32.vlgmr.msrb.gmra.mxu0 %v2005_v17 }
  0x54   : > { %584 = vmatmul.f32.vlgmr.msrb.gmra.mxu1 %v2005_v17 }
  0x56   : > { %633 = vmatmul.f32.gmra.mxu2 %v2098_v2  ;;  %694 = vmatmul.f32.gmra.mxu3 %v2025_v27 }
  0x58   : > { %551 = vmatmul.f32.gmra.mxu0 %v2025_v27 }
  0x5c   : > { %588 = vmatmul.f32.gmra.mxu1 %v2025_v27 }
  0x5e   : > { %641 = vmatmul.f32.gmra.mxu2 %v362_v16  ;;  %698 = vmatmul.f32.gmra.mxu3 %v2044_v34  ;;  %v274_v16 = vld [vmem:[%s2460_s3 + $0x8] sm:$0xff] }
  0x60   : > { %555 = vmatmul.f32.gmra.mxu0 %v2044_v34 }
  0x64   : > { %592 = vmatmul.f32.gmra.mxu1 %v2044_v34 }
  0x66   : > { %649 = vmatmul.f32.gmra.mxu2 %v370_v6  ;;  %702 = vmatmul.f32.gmra.mxu3 %v2095_v0  ;;  %v2209_v6 = vsub.f32 %v907_v1, %v2203_v13 }
  0x68   : > { %559 = vmatmul.f32.gmra.mxu0 %v2095_v0 }
  0x6c   : > { %596 = vmatmul.f32.gmra.mxu1 %v2095_v0 }
  0x6e   : > { %825 = vmatmul.f32.vlgmr.msra.gmra.mxu2 %v2005_v17  ;;  %862 = vmatmul.f32.vlgmr.msra.gmra.mxu3 %v2005_v17 }
  0x70   : > { %732 = vmatmul.f32.vlgmr.msra.gmra.mxu0 %v2019_v23 }
  0x74   : > { %774 = vmatmul.f32.vlgmr.msra.gmra.mxu1 %v2031_v29 }
  0x76   : > { %829 = vmatmul.f32.gmra.mxu2 %v2025_v27  ;;  %866 = vmatmul.f32.gmra.mxu3 %v2025_v27 }
  0x78   : > { %737 = vmatmul.f32.gmra.mxu0 %v2042_v33 }
  0x7c   : > { %780 = vmatmul.f32.gmra.mxu1 %v2062_v45 }
  0x7e   : > { %833 = vmatmul.f32.gmra.mxu2 %v2044_v34  ;;  %870 = vmatmul.f32.gmra.mxu3 %v2044_v34 }
  0x80   : > { %742 = vmatmul.f32.gmra.mxu0 %v2078_v51 }
  0x84   : > { %786 = vmatmul.f32.gmra.mxu1 %v2093_v63 }
  0x86   : > { %837 = vmatmul.f32.gmra.mxu2 %v2095_v0  ;;  %874 = vmatmul.f32.gmra.mxu3 %v2095_v0 }
  0x88   : > { %747 = vmatmul.f32.gmra.mxu0 %v2111_v14 }
  0x8c   : > { %792 = vmatmul.f32.gmra.mxu1 %v2118_v18 }
  0x96   : > { %v2177_v33 = vpop.permute.xlu1 %296 }
  0x98   : > { %v2175_v32 = vpop.permute.xlu0 %306 }
  0x9e   : > { %v2181_v39 = vpop.permute.xlu1 %291 }
  0xa3   : > { %v2179_v38 = vpop.permute.xlu0 %301 }
  0xad   : > { %v348_v17 = vpop.f32.mrf.mxu0 }
  0xae   : > { %v349_v45 = vadd.f32 %v348_v17, %v2181_v39 }
  0xb1   : > { %v413_v20 = vpop.f32.mrf.mxu1  ;;  %v455_v21 = vpop.f32.mrf.mxu2 }
  0xb2   : > { %v497_v22 = vpop.f32.mrf.mxu3  ;;  %v414_v49 = vadd.f32 %v413_v20, %v349_v45  ;;  %v910_v20 = vsel %vm309_vm0, %v274_v16, 0 }
  0xb4   : > { %v456_v56 = vadd.f32 %v455_v21, %v414_v49 }
  0xb5   : > { %v356_v23 = vpop.f32.mrf.mxu0 }
  0xb6   : > { %v357_v42 = vadd.f32 %v356_v23, %v2177_v33  ;;  %v498_v62 = vadd.f32 %v497_v22, %v456_v56 }
  0xb9   : > { %v417_v24 = vpop.f32.mrf.mxu1  ;;  %v460_v25 = vpop.f32.mrf.mxu2 }
  0xba   : > { %v503_v26 = vpop.f32.mrf.mxu3  ;;  %v418_v47 = vadd.f32 %v417_v24, %v357_v42 }
  0xbc   : > { %v461_v52 = vadd.f32 %v460_v25, %v418_v47 }
  0xbd   : > { %v364_v27 = vpop.f32.mrf.mxu0 }
  0xbe   : > { %v365_v43 = vadd.f32 %v364_v27, %v2179_v38  ;;  %v504_v59 = vadd.f32 %v503_v26, %v461_v52  ;;  %v2221_v26 = vand.u32 4294901760, %v2209_v6  ;;  %v2223_v27 = vand.u32 4294901760, %v910_v20 }
  0xc1   : > { %v421_v28 = vpop.f32.mrf.mxu1  ;;  %v465_v29 = vpop.f32.mrf.mxu2 }
  0xc2   : > { %v509_v30 = vpop.f32.mrf.mxu3  ;;  %v422_v48 = vadd.f32 %v421_v28, %v365_v43 }
  0xc4   : > { %v466_v53 = vadd.f32 %v465_v29, %v422_v48 }
  0xc5   : > { %v372_v31 = vpop.f32.mrf.mxu0 }
  0xc6   : > { %v373_v54 = vadd.f32 %v372_v31, %v2175_v32  ;;  %v510_v60 = vadd.f32 %v509_v30, %v466_v53 }
  0xc9   : > { %v425_v34 = vpop.f32.mrf.mxu1  ;;  %v470_v35 = vpop.f32.mrf.mxu2 }
  0xca   : > { %v515_v36 = vpop.f32.mrf.mxu3  ;;  %v426_v61 = vadd.f32 %v425_v34, %v373_v54  ;;  %v275_v34 = vld [vmem:[%s2460_s3 + $0x10] sm:$0xff] }
  0xcc   : > { %v471_v7 = vadd.f32 %v470_v35, %v426_v61  ;;  %v276_v61 = vld [vmem:[%s2460_s3 + $0x18] sm:$0xff] }
  0xcd   : > { %v548_v37 = vpop.f32.mrf.mxu0 }
  0xce   : > { %v549_v8 = vadd.f32 %v548_v37, %v498_v62  ;;  %v516_v18 = vadd.f32 %v515_v36, %v471_v7  ;;  %v941_v37 = vsub.f32 %v2209_v6, %v2221_v26 }
  0xd0   : > { %v2256_v53 = vand.u32 4294901760, %v941_v37 }
  0xd1   : > { %v585_v40 = vpop.f32.mrf.mxu1  ;;  %v2183_v41 = vpop.f32.mrf.mxu2 }
  0xd2   : > { %v2187_v44 = vpop.f32.mrf.mxu3  ;;  %v586_v14 = vadd.f32 %v585_v40, %v549_v8  ;;  %v2239_v40 = vsub.f32 %v910_v20, %v2223_v27  ;;  %v627_v7 = vadd.f32 %v2183_v41, %v2181_v39  ;;  %v916_v8 = vsel %vm309_vm0, %v276_v61, 0 }
  0xd4   : > { %v878_v10 = vmax.f32 %v586_v14, 0.0  ;;  %v2259_v54 = vand.u32 4294901760, %v2239_v40 }
  0xd5   : > { %v552_v46 = vpop.f32.mrf.mxu0 }
  0xd6   : > { %v553_v63 = vadd.f32 %v552_v46, %v504_v59  ;;  %v2225_v28 = vand.u32 4294901760, %v878_v10  ;;  %v913_v46 = vsel %vm309_vm0, %v275_v34, 0  ;;  %v949_v1 = vsub.f32 %v2239_v40, %v2259_v54 }
  0xd7   : > { %v2261_v56 = vand.u32 4294901760, %v913_v46 }
  0xd8   : > { %v2242_v42 = vsub.f32 %v878_v10, %v2225_v28 }
  0xd9   : > { %v589_v50 = vpop.f32.mrf.mxu1  ;;  %v2190_v51 = vpop.f32.mrf.mxu2 }
  0xda   : > { %v2193_v55 = vpop.f32.mrf.mxu3  ;;  %v590_v9 = vadd.f32 %v589_v50, %v553_v63  ;;  %v635_v62 = vadd.f32 %v2190_v51, %v2177_v33 }
  0xdc   : > { %v880_v5 = vmax.f32 %v590_v9, 0.0  ;;  %v696_v14 = vadd.f32 %v2193_v55, %v635_v62 }
  0xdd   : > { %v556_v57 = vpop.f32.mrf.mxu0 }
  0xde   : > { %v557_v0 = vadd.f32 %v556_v57, %v510_v60  ;;  %v2216_v23 = vand.u32 4294901760, %v880_v5  ;;  %v1003_v60 = vand.u32 4294901760, %v2242_v42 }
  0xe0   : > { %v996_v35 = vsub.f32 %v880_v5, %v2216_v23  ;;  %v1004_v51 = vsub.f32 %v2242_v42, %v1003_v60  ;;  %v692_v5 = vadd.f32 %v2187_v44, %v627_v7 }
  0xe1   : > { %v593_v2 = vpop.f32.mrf.mxu1  ;;  %v2199_v3 = vpop.f32.mrf.mxu2 }
  0xe2   : > { %v594_v11 = vadd.f32 %v593_v2, %v557_v0  ;;  %v2201_v12 = vpop.f32.mrf.mxu3  ;;  %v997_v52 = vand.u32 4294901760, %v996_v35  ;;  %v2277_v2 = vsub.f32 %v913_v46, %v2261_v56 }
  0xe4   : > { %v882_v15 = vmax.f32 %v594_v11, 0.0  ;;  %v998_v0 = vsub.f32 %v996_v35, %v997_v52  ;;  %v2292_v16 = vand.u32 4294901760, %v2277_v2 }
  0xe5   : > { %v560_v4 = vpop.f32.mrf.mxu0 }
  0xe6   : > { %v2211_v19 = vand.u32 4294901760, %v882_v15  ;;  %v561_v17 = vadd.f32 %v560_v4, %v516_v18  ;;  %v999_v39 = vand.u32 4294901760, %v998_v0  ;;  %v2289_v4 = vand.u32 4294901760, %v949_v1 }
  0xe7   : > { %v2294_v18 = vand.u32 4294901760, %v916_v8 }
  0xe8   : > { %v990_v29 = vsub.f32 %v882_v15, %v2211_v19  ;;  %v643_v15 = vadd.f32 %v2199_v3, %v2179_v38  ;;  %v1005_v38 = vand.u32 4294901760, %v1004_v51 }
  0xe9   : > { %v597_v21 = vpop.f32.mrf.mxu1  ;;  %v2214_v22 = vpop.f32.mrf.mxu2  ;;  %v2304_v44 = vsub.f32 %v916_v8, %v2294_v18 }
  0xea   : > { %v598_v24 = vadd.f32 %v597_v21, %v561_v17  ;;  %v2218_v25 = vpop.f32.mrf.mxu3  ;;  %v991_v45 = vand.u32 4294901760, %v990_v29  ;;  %v700_v3 = vadd.f32 %v2201_v12, %v643_v15  ;;  %v957_v21 = vsub.f32 %v2277_v2, %v2292_v16 }
  0xec   : > { %v884_v30 = vmax.f32 %v598_v24, 0.0  ;;  %v992_v59 = vsub.f32 %v990_v29, %v991_v45 }
  0xed   : > { %v2228_v31 = vpop.f32.mrf.mxu0 }
  0xee   : > { %v2234_v36 = vand.u32 4294901760, %v884_v30  ;;  %v993_v33 = vand.u32 4294901760, %v992_v59  ;;  %v734_v17 = vadd.f32 %v2228_v31, %v692_v5  ;;  %v651_v31 = vadd.f32 %v2214_v22, %v2175_v32 }
  0xf0   : > { %v984_v43 = vsub.f32 %v884_v30, %v2234_v36  ;;  %931 = vmatpush.msrb.mxu0 %v2234_v36  ;;  %1082 = vmatpush.msrb.mxu3 %v2234_v36  ;;  %v704_v32 = vadd.f32 %v2218_v25, %v651_v31 }
  0xf1   : > { %v2248_v47 = vpop.f32.mrf.mxu1  ;;  %v2250_v48 = vpop.f32.mrf.mxu2 }
  0xf2   : > { %v985_v49 = vand.u32 4294901760, %v984_v43  ;;  %933 = vmatpush.msrb.mxu0 %v2211_v19  ;;  %1038 = vmatpush.msrb.mxu2 %v984_v43  ;;  %v2253_v50 = vpop.f32.mrf.mxu3  ;;  %v776_v24 = vadd.f32 %v2248_v47, %v734_v17 }
  0xf3   : > { %1084 = vmatpush.msrb.mxu3 %v2211_v19 }
  0xf4   : > { %v986_v57 = vsub.f32 %v984_v43, %v985_v49  ;;  %935 = vmatpush.msrb.mxu0 %v2216_v23  ;;  %1041 = vmatpush.msrb.mxu2 %v990_v29  ;;  %v2316_v43 = vand.u32 4294901760, %v2304_v44 }
  0xf5   : > { %v738_v58 = vpop.f32.mrf.mxu0  ;;  %1086 = vmatpush.msrb.mxu3 %v2216_v23 }
  0xf6   : > { %937 = vmatpush.msrb.mxu0 %v2225_v28  ;;  %1044 = vmatpush.msrb.mxu2 %v996_v35  ;;  %v987_v63 = vand.u32 4294901760, %v986_v57  ;;  %v739_v10 = vadd.f32 %v738_v58, %v696_v14 }
  0xf7   : > { %1088 = vmatpush.msrb.mxu3 %v2225_v28  ;;  %943 = vmatmul.f32.vlgmr.msrb.gmra.mxu0 %v2256_v53 }
  0xf8   : > { %1129 = vmatpush.msra.mxu0 %v985_v49  ;;  %988 = vmatpush.msrb.mxu1 %v987_v63 }
  0xf9   : > { %1047 = vmatpush.msrb.mxu2 %v2242_v42  ;;  %v781_v9 = vpop.f32.mrf.mxu1  ;;  %v830_v11 = vpop.f32.mrf.mxu2  ;;  %1092 = vmatmul.f32.vlgmr.msrb.gmra.mxu3 %v2221_v26  ;;  %v2313_v42 = vand.u32 4294901760, %v957_v21 }
  0xfa   : > { %1133 = vmatpush.msra.mxu0 %v991_v45  ;;  %994 = vmatpush.msrb.mxu1 %v993_v33  ;;  %v867_v41 = vpop.f32.mrf.mxu3  ;;  %v782_v20 = vadd.f32 %v781_v9, %v739_v10 }
  0xfb   : > { %1050 = vmatmul.f32.vlgmr.msrb.gmra.mxu2 %v2209_v6 }
  0xfc   : > { %1137 = vmatpush.msra.mxu0 %v997_v52  ;;  %1000 = vmatpush.msrb.mxu1 %v999_v39  ;;  %v831_v34 = vadd.f32 %v830_v11, %v782_v20 }
  0xfd   : > { %v743_v55 = vpop.f32.mrf.mxu0 }
  0xfe   : > { %1141 = vmatpush.msra.mxu0 %v1003_v60  ;;  %1006 = vmatpush.msrb.mxu1 %v1005_v38  ;;  %v744_v29 = vadd.f32 %v743_v55, %v700_v3  ;;  %v868_v22 = vadd.f32 %v867_v41, %v831_v34 }
  0xff   : > { %951 = vmatmul.f32.gmra.mxu0 %v2289_v4  ;;  %1008 = vmatmul.f32.vlgmr.msrb.gmra.mxu1 %v2203_v13 }
 0x100   : > { %1172 = vmatpush.msra.mxu1 %v2234_v36  ;;  %v827_v36 = vadd.f32 %v2250_v48, %v776_v24  ;;  %v277_v48 = vld [vmem:[%s2461_s4] sm:$0xff] }
 0x101   : > { %v787_v12 = vpop.f32.mrf.mxu1  ;;  %v834_v30 = vpop.f32.mrf.mxu2  ;;  %1098 = vmatmul.f32.gmra.mxu3 %v2259_v54  ;;  %888 = vperm.xlu2 %1729, %v277_v48  }
 0x102   : > { %v788_v35 = vadd.f32 %v787_v12, %v744_v29  ;;  %1174 = vmatpush.msra.mxu1 %v2211_v19  ;;  %v871_v37 = vpop.f32.mrf.mxu3  ;;  %v965_v19 = vsub.f32 %v2304_v44, %v2316_v43 }
 0x103   : > { %1055 = vmatmul.f32.gmra.mxu2 %v2239_v40 }
 0x104   : > { %v835_v45 = vadd.f32 %v834_v30, %v788_v35  ;;  %1176 = vmatpush.msra.mxu1 %v2216_v23  ;;  %v864_v23 = vadd.f32 %v2253_v50, %v827_v36  ;;  %v2332_v60 = vand.u32 4294901760, %v965_v19  ;;  %v278_v50 = vld [vmem:[%s2461_s4 + $0x8] sm:$0xff] }
 0x105   : > { %v748_v46 = vpop.f32.mrf.mxu0 }
 0x106   : > { %v872_v47 = vadd.f32 %v871_v37, %v835_v45  ;;  %1178 = vmatpush.msra.mxu1 %v2225_v28  ;;  %v749_v49 = vadd.f32 %v748_v46, %v704_v32  ;;  %v881_v28 = vmax.f32 %v868_v22, 0.0  ;;  %v879_v61 = vmax.f32 %v864_v23, 0.0  ;;  %v899_v46 = vpop.permute.xlu0 %898 }
 0x107   : > { %959 = vmatmul.f32.gmra.mxu0 %v2313_v42  ;;  %1012 = vmatmul.f32.gmra.mxu1 %v2223_v27 }
 0x108   : > { %v883_v52 = vmax.f32 %v872_v47, 0.0  ;;  %v1212_v0 = vand.u32 4294901760, %v881_v28  ;;  %v1214_v7 = vand.u32 4294901760, %v879_v61 }
 0x109   : > { %v793_v25 = vpop.f32.mrf.mxu1  ;;  %v838_v57 = vpop.f32.mrf.mxu2  ;;  %1104 = vmatmul.f32.gmra.mxu3 %v2292_v16  ;;  %893 = vperm.xlu2 %1729, %v278_v50  }
 0x10a   : > { %v794_v58 = vadd.f32 %v793_v25, %v749_v49  ;;  %v875_v59 = vpop.f32.mrf.mxu3  ;;  %v1210_v62 = vand.u32 4294901760, %v883_v52  ;;  %v1274_v8 = vsub.f32 %v881_v28, %v1212_v0  ;;  %v1280_v11 = vsub.f32 %v879_v61, %v1214_v7  ;;  %v2380_v25 = vpop.permute.xlu1 %903 }
 0x10b   : > { %1060 = vmatmul.f32.gmra.mxu2 %v2277_v2 }
 0x10c   : > { %v839_v63 = vadd.f32 %v838_v57, %v794_v58  ;;  %v1268_v33 = vsub.f32 %v883_v52, %v1210_v62  ;;  %v1275_v41 = vand.u32 4294901760, %v1274_v8  ;;  %v1281_v55 = vand.u32 4294901760, %v1280_v11 }
 0x10e   : > { %v876_v1 = vadd.f32 %v875_v59, %v839_v63  ;;  %v1269_v15 = vand.u32 4294901760, %v1268_v33  ;;  %v1276_v3 = vsub.f32 %v1274_v8, %v1275_v41  ;;  %v1282_v20 = vsub.f32 %v1280_v11, %v1281_v55 }
 0x10f   : > { %967 = vmatmul.f32.gmra.mxu0 %v2332_v60  ;;  %1016 = vmatmul.f32.gmra.mxu1 %v2261_v56 }
 0x110   : > { %v885_v51 = vmax.f32 %v876_v1, 0.0  ;;  %v1270_v10 = vsub.f32 %v1268_v33, %v1269_v15  ;;  %v1277_v21 = vand.u32 4294901760, %v1276_v3  ;;  %v1283_v24 = vand.u32 4294901760, %v1282_v20 }
 0x111   : > { %1110 = vmatmul.f32.gmra.mxu3 %v2316_v43 }
 0x112   : > { %v1208_v9 = vand.u32 4294901760, %v885_v51  ;;  %v1271_v17 = vand.u32 4294901760, %v1270_v10 }
 0x113   : > { %1065 = vmatmul.f32.gmra.mxu2 %v2304_v44 }
 0x114   : > { %v1262_v14 = vsub.f32 %v885_v51, %v1208_v9  ;;  %1209 = vmatpush.msra.mxu2 %v1208_v9  ;;  %1360 = vmatpush.msrb.mxu1 %v1208_v9 }
 0x116   : > { %v1263_v39 = vand.u32 4294901760, %v1262_v14  ;;  %1211 = vmatpush.msra.mxu2 %v1210_v62  ;;  %1316 = vmatpush.msrb.mxu0 %v1262_v14 }
 0x117   : > { %1362 = vmatpush.msrb.mxu1 %v1210_v62  ;;  %1143 = vmatmul.f32.vlgmr.msra.gmra.mxu0 %v2203_v13 }
 0x118   : > { %v1264_v5 = vsub.f32 %v1262_v14, %v1263_v39  ;;  %1020 = vmatmul.f32.gmra.mxu1 %v2294_v18  ;;  %1213 = vmatpush.msra.mxu2 %v1212_v0 }
 0x119   : > { %1319 = vmatpush.msrb.mxu0 %v1268_v33  ;;  %1364 = vmatpush.msrb.mxu1 %v1212_v0 }
 0x11a   : > { %1215 = vmatpush.msra.mxu2 %v1214_v7  ;;  %v1265_v38 = vand.u32 4294901760, %v1264_v5 }
 0x11b   : > { %1322 = vmatpush.msrb.mxu0 %v1274_v8  ;;  %1366 = vmatpush.msrb.mxu1 %v1214_v7 }
 0x11c   : > { %1221 = vmatmul.f32.vlgmr.msra.gmra.mxu2 %v2256_v53  ;;  %1266 = vmatpush.msra.mxu3 %v1265_v38 }
 0x11d   : > { %1407 = vmatpush.msrb.mxu2 %v1263_v39  ;;  %1325 = vmatpush.msrb.mxu0 %v1280_v11 }
 0x11e   : > { %1272 = vmatpush.msra.mxu3 %v1271_v17 }
 0x11f   : > { %1411 = vmatpush.msrb.mxu2 %v1269_v15  ;;  %1147 = vmatmul.f32.gmra.mxu0 %v2223_v27 }
 0x120   : > { %1180 = vmatmul.f32.vlgmr.msra.gmra.mxu1 %v2203_v13  ;;  %1278 = vmatpush.msra.mxu3 %v1277_v21 }
 0x121   : > { %1415 = vmatpush.msrb.mxu2 %v1275_v41 }
 0x122   : > { %1284 = vmatpush.msra.mxu3 %v1283_v24 }
 0x123   : > { %1419 = vmatpush.msrb.mxu2 %v1281_v55  ;;  %1286 = vmatmul.f32.vlgmr.msra.gmra.mxu3 %v2203_v13 }
 0x124   : > { %1229 = vmatmul.f32.gmra.mxu2 %v2289_v4  ;;  %1450 = vmatpush.msrb.mxu3 %v1208_v9 }
 0x126   : > { %1452 = vmatpush.msrb.mxu3 %v1210_v62 }
 0x127   : > { %1151 = vmatmul.f32.gmra.mxu0 %v2261_v56 }
 0x128   : > { %1184 = vmatmul.f32.gmra.mxu1 %v2223_v27  ;;  %1454 = vmatpush.msrb.mxu3 %v1212_v0 }
 0x12a   : > { %1456 = vmatpush.msrb.mxu3 %v1214_v7 }
 0x12b   : > { %1290 = vmatmul.f32.gmra.mxu3 %v2223_v27 }
 0x12c   : > { %1237 = vmatmul.f32.gmra.mxu2 %v2313_v42 }
 0x12f   : > { %1155 = vmatmul.f32.gmra.mxu0 %v2294_v18 }
 0x130   : > { %1188 = vmatmul.f32.gmra.mxu1 %v2261_v56 }
 0x133   : > { %1294 = vmatmul.f32.gmra.mxu3 %v2261_v56 }
 0x134   : > { %1245 = vmatmul.f32.gmra.mxu2 %v2332_v60 }
 0x137   : > { %1328 = vmatmul.f32.vlgmr.msrb.gmra.mxu0 %v2209_v6 }
 0x138   : > { %1192 = vmatmul.f32.gmra.mxu1 %v2294_v18 }
 0x13b   : > { %1298 = vmatmul.f32.gmra.mxu3 %v2294_v18 }
 0x13c   : > { %1421 = vmatmul.f32.vlgmr.msrb.gmra.mxu2 %v2203_v13 }
 0x13f   : > { %1333 = vmatmul.f32.gmra.mxu0 %v2239_v40 }
 0x140   : > { %1370 = vmatmul.f32.vlgmr.msrb.gmra.mxu1 %v2221_v26 }
 0x143   : > { %1458 = vmatmul.f32.vlgmr.msrb.gmra.mxu3 %v2203_v13 }
 0x144   : > { %1425 = vmatmul.f32.gmra.mxu2 %v2223_v27 }
 0x147   : > { %1338 = vmatmul.f32.gmra.mxu0 %v2277_v2 }
 0x148   : > { %1376 = vmatmul.f32.gmra.mxu1 %v2259_v54 }
 0x14b   : > { %1462 = vmatmul.f32.gmra.mxu3 %v2223_v27 }
 0x14c   : > { %1429 = vmatmul.f32.gmra.mxu2 %v2261_v56 }
 0x14f   : > { %1343 = vmatmul.f32.gmra.mxu0 %v2304_v44 }
 0x150   : > { %1382 = vmatmul.f32.gmra.mxu1 %v2292_v16 }
 0x153   : > { %1466 = vmatmul.f32.gmra.mxu3 %v2261_v56 }
 0x154   : > { %1433 = vmatmul.f32.gmra.mxu2 %v2294_v18 }
 0x158   : > { %1388 = vmatmul.f32.gmra.mxu1 %v2316_v43 }
 0x15b   : > { %1470 = vmatmul.f32.gmra.mxu3 %v2294_v18  ;;  %v2374_v12 = vpop.permute.xlu2 %888 }
 0x163   : > { %v2376_v35 = vpop.permute.xlu2 %893 }
 0x174   : > { %v944_v13 = vpop.f32.mrf.mxu0 }
 0x175   : > { %v945_v45 = vadd.f32 %v944_v13, %v2374_v12 }
 0x17c   : > { %v952_v6 = vpop.f32.mrf.mxu0  ;;  %v1009_v26 = vpop.f32.mrf.mxu1 }
 0x17d   : > { %v1093_v53 = vpop.f32.mrf.mxu3  ;;  %v953_v43 = vadd.f32 %v952_v6, %v2376_v35  ;;  %v1010_v19 = vadd.f32 %v1009_v26, %v945_v45 }
 0x17e   : > { %v1051_v40 = vpop.f32.mrf.mxu2 }
 0x17f   : > { %v1052_v59 = vadd.f32 %v1051_v40, %v1010_v19 }
 0x181   : > { %v1094_v63 = vadd.f32 %v1093_v53, %v1052_v59 }
 0x184   : > { %v960_v27 = vpop.f32.mrf.mxu0  ;;  %v1013_v54 = vpop.f32.mrf.mxu1 }
 0x185   : > { %v1099_v4 = vpop.f32.mrf.mxu3  ;;  %v961_v32 = vadd.f32 %v960_v27, %v899_v46  ;;  %v1014_v22 = vadd.f32 %v1013_v54, %v953_v43 }
 0x186   : > { %v1056_v2 = vpop.f32.mrf.mxu2 }
 0x187   : > { %v1057_v49 = vadd.f32 %v1056_v2, %v1014_v22 }
 0x189   : > { %v1100_v61 = vadd.f32 %v1099_v4, %v1057_v49 }
 0x18c   : > { %v968_v44 = vpop.f32.mrf.mxu0  ;;  %v1017_v29 = vpop.f32.mrf.mxu1 }
 0x18d   : > { %v1105_v56 = vpop.f32.mrf.mxu3  ;;  %v1018_v47 = vadd.f32 %v1017_v29, %v961_v32  ;;  %v969_v28 = vadd.f32 %v968_v44, %v2380_v25 }
 0x18e   : > { %v1061_v16 = vpop.f32.mrf.mxu2 }
 0x18f   : > { %v1062_v58 = vadd.f32 %v1061_v16, %v1018_v47 }
 0x191   : > { %v1106_v62 = vadd.f32 %v1105_v56, %v1062_v58 }
 0x194   : > { %v1144_v30 = vpop.f32.mrf.mxu0 }
 0x195   : > { %v1021_v31 = vpop.f32.mrf.mxu1  ;;  %v1111_v42 = vpop.f32.mrf.mxu3  ;;  %v1145_v7 = vadd.f32 %v1144_v30, %v1094_v63 }
 0x196   : > { %v1066_v34 = vpop.f32.mrf.mxu2  ;;  %v1022_v60 = vadd.f32 %v1021_v31, %v969_v28 }
 0x198   : > { %v1067_v33 = vadd.f32 %v1066_v34, %v1022_v60 }
 0x19a   : > { %v1112_v39 = vadd.f32 %v1111_v42, %v1067_v33 }
 0x19c   : > { %v1148_v18 = vpop.f32.mrf.mxu0 }
 0x19d   : > { %v1181_v37 = vpop.f32.mrf.mxu1  ;;  %v1149_v0 = vadd.f32 %v1148_v18, %v1100_v61 }
 0x19e   : > { %v2385_v14 = vadd.f32 %v1181_v37, %v1145_v7 }
 0x19f   : > { %v1222_v36 = vpop.f32.mrf.mxu2 }
 0x1a0   : > { %v1474_v5 = vmul.f32 %v2385_v14, %v2385_v14  ;;  %v1223_v43 = vadd.f32 %v1222_v36, %v2374_v12 }
 0x1a4   : > { %v1152_v48 = vpop.f32.mrf.mxu0 }
 0x1a5   : > { %v1185_v23 = vpop.f32.mrf.mxu1  ;;  %v1153_v51 = vadd.f32 %v1152_v48, %v1106_v62 }
 0x1a6   : > { %v1287_v52 = vpop.f32.mrf.mxu3  ;;  %v2383_v8 = vadd.f32 %v1185_v23, %v1149_v0 }
 0x1a7   : > { %v1230_v57 = vpop.f32.mrf.mxu2  ;;  %v1288_v47 = vadd.f32 %v1287_v52, %v1223_v43 }
 0x1a8   : > { %v1476_v41 = vmul.f32 %v2383_v8, %v2383_v8  ;;  %v1231_v37 = vadd.f32 %v1230_v57, %v2376_v35 }
 0x1aa   : > { %v1482_v17 = vadd.f32 %v1476_v41, %v1474_v5 }
 0x1ac   : > { %v1156_v1 = vpop.f32.mrf.mxu0 }
 0x1ad   : > { %v1189_v50 = vpop.f32.mrf.mxu1  ;;  %v1157_v10 = vadd.f32 %v1156_v1, %v1112_v39 }
 0x1ae   : > { %v1291_v9 = vpop.f32.mrf.mxu3  ;;  %v2387_v15 = vadd.f32 %v1189_v50, %v1153_v51 }
 0x1af   : > { %v1238_v11 = vpop.f32.mrf.mxu2  ;;  %v1292_v32 = vadd.f32 %v1291_v9, %v1231_v37 }
 0x1b0   : > { %v1478_v55 = vmul.f32 %v2387_v15, %v2387_v15  ;;  %v1239_v45 = vadd.f32 %v1238_v11, %v899_v46 }
 0x1b2   : > { %v1483_v13 = vadd.f32 %v1482_v17, %v1478_v55 }
 0x1b4   : > { %v1329_v3 = vpop.f32.mrf.mxu0 }
 0x1b5   : > { %v1193_v38 = vpop.f32.mrf.mxu1  ;;  %v1330_v28 = vadd.f32 %v1329_v3, %v1288_v47 }
 0x1b6   : > { %v2395_v20 = vadd.f32 %v1193_v38, %v1157_v10  ;;  %v1295_v21 = vpop.f32.mrf.mxu3 }
 0x1b7   : > { %v1246_v24 = vpop.f32.mrf.mxu2  ;;  %v1296_v48 = vadd.f32 %v1295_v21, %v1239_v45 }
 0x1b8   : > { %v1480_v6 = vmul.f32 %v2395_v20, %v2395_v20  ;;  %v1247_v62 = vadd.f32 %v1246_v24, %v2380_v25 }
 0x1ba   : > { %v1484_v26 = vadd.f32 %v1483_v13, %v1480_v6 }
 0x1bc   : > { %v1485_v40 = vrot.slane %v1484_v26, 4  ;;  %v1334_v2 = vpop.f32.mrf.mxu0 }
 0x1bd   : > { %v1371_v53 = vpop.f32.mrf.mxu1  ;;  %v1335_v23 = vadd.f32 %v1334_v2, %v1292_v32 }
 0x1be   : > { %v1486_v27 = vadd.f32 %v1485_v40, %v1484_v26  ;;  %v1299_v54 = vpop.f32.mrf.mxu3  ;;  %v1372_v35 = vadd.f32 %v1371_v53, %v1330_v28 }
 0x1bf   : > { %v1422_v4 = vpop.f32.mrf.mxu2  ;;  %v1300_v36 = vadd.f32 %v1299_v54, %v1247_v62 }
 0x1c0   : > { %v1487_v44 = vrot.slane %v1486_v27, 2  ;;  %v1423_v1 = vadd.f32 %v1422_v4, %v1372_v35 }
 0x1c2   : > { %v1488_v29 = vadd.f32 %v1487_v44, %v1486_v27 }
 0x1c4   : > { %v1489_v16 = vrot.slane %v1488_v29, 1  ;;  %v1339_v42 = vpop.f32.mrf.mxu0 }
 0x1c5   : > { %v1377_v56 = vpop.f32.mrf.mxu1  ;;  %v1340_v60 = vadd.f32 %v1339_v42, %v1296_v48 }
 0x1c6   : > { %v1490_v30 = vadd.f32 %v1489_v16, %v1488_v29  ;;  %v1459_v31 = vpop.f32.mrf.mxu3  ;;  %v1378_v61 = vadd.f32 %v1377_v56, %v1335_v23 }
 0x1c7   : > { %v1426_v34 = vpop.f32.mrf.mxu2  ;;  %v1460_v11 = vadd.f32 %v1459_v31, %v1423_v1 }
 0x1c8   : > { %v1500_v18 = vmax.f32 %v1490_v30, 1e-24  ;;  %v1427_v0 = vadd.f32 %v1426_v34, %v1378_v61 }
 0x1c9   : > { %v1475_v24 = vmul.f32 %v1460_v11, %v1460_v11 }
 0x1ca   : > { %1730 = vrsqrt.f32 %v1500_v18  ;;  %vm1508_vm2 = vweird.f32 %v1500_v18 }
 0x1cc   : > { %v1344_v63 = vpop.f32.mrf.mxu0 }
 0x1cd   : > { %v1383_v22 = vpop.f32.mrf.mxu1  ;;  %v1345_v52 = vadd.f32 %v1344_v63, %v1300_v36 }
 0x1ce   : > { %v1463_v19 = vpop.f32.mrf.mxu3  ;;  %v1384_v12 = vadd.f32 %v1383_v22, %v1340_v60 }
 0x1cf   : > { %v1430_v58 = vpop.f32.mrf.mxu2  ;;  %v1464_v9 = vadd.f32 %v1463_v19, %v1427_v0 }
 0x1d0   : > { %v1731_v49 = vpop.eup %1730  ;;  %v1431_v51 = vadd.f32 %v1430_v58, %v1384_v12 }
 0x1d1   : > { %v1503_v59 = vmul.f32 %v1731_v49, %v1500_v18  ;;  %vm1509_vm1 = vweird.f32 %v1731_v49  ;;  %v1477_v55 = vmul.f32 %v1464_v9, %v1464_v9 }
 0x1d2   : > { %vm1510_vm3 = vmor %vm1508_vm2, %vm1509_vm1 }
 0x1d3   : > { %v1504_v57 = vmul.f32 %v1731_v49, %v1503_v59 }
 0x1d5   : > { %v1505_v46 = vmul.f32 0.5, %v1504_v57  ;;  %v1389_v50 = vpop.f32.mrf.mxu1 }
 0x1d6   : > { %v1467_v7 = vpop.f32.mrf.mxu3  ;;  %v1390_v25 = vadd.f32 %v1389_v50, %v1345_v52 }
 0x1d7   : > { %v1506_v33 = vsub.f32 1.5, %v1505_v46  ;;  %v1468_v41 = vadd.f32 %v1467_v7, %v1431_v51  ;;  %v1434_v5 = vpop.f32.mrf.mxu2 }
 0x1d8   : > { %v1435_v13 = vadd.f32 %v1434_v5, %v1390_v25 }
 0x1d9   : > { %v1507_v39 = vmul.f32 %v1731_v49, %v1506_v33  ;;  %v1479_v6 = vmul.f32 %v1468_v41, %v1468_v41 }
 0x1db   : > { %v1511_v10 = vsel %vm1510_vm3, %v1731_v49, %v1507_v39 }
 0x1dc   : > { %v1522_v38 = vmul.f32 %v1511_v10, %v2385_v14  ;;  %v1524_v3 = vmul.f32 %v1511_v10, %v2383_v8  ;;  %v1526_v17 = vmul.f32 %v1511_v10, %v2387_v15  ;;  %v1528_v21 = vmul.f32 %v1511_v10, %v2395_v20 }
 0x1dd   : > { %v1491_v14 = vadd.f32 %v1477_v55, %v1475_v24 }
 0x1de   : > { %1530 = vst [vmem:[%s2408_s16] sm:$0xff] %v1522_v38  ;;  %v1471_v26 = vpop.f32.mrf.mxu3 }
 0x1df   : > { %1532 = vst [vmem:[%s2408_s16 + $0x10] sm:$0xff] %v1524_v3  ;;  %v1472_v40 = vadd.f32 %v1471_v26, %v1435_v13  ;;  %v1492_v8 = vadd.f32 %v1491_v14, %v1479_v6 }
 0x1e0   : > { %1534 = vst [vmem:[%s2408_s16 + $0x20] sm:$0xff] %v1526_v17 }
 0x1e1   : > { %1536 = vst [vmem:[%s2408_s16 + $0x30] sm:$0xff] %v1528_v21  ;;  %v1481_v15 = vmul.f32 %v1472_v40, %v1472_v40 }
 0x1e3   : > { %v1493_v20 = vadd.f32 %v1492_v8, %v1481_v15 }
 0x1e5   : > { %v1494_v53 = vrot.slane %v1493_v20, 4 }
 0x1e7   : > { %v1495_v27 = vadd.f32 %v1494_v53, %v1493_v20 }
 0x1e9   : > { %v1496_v54 = vrot.slane %v1495_v27, 2 }
 0x1eb   : > { %v1497_v2 = vadd.f32 %v1496_v54, %v1495_v27 }
 0x1ed   : > { %v1498_v4 = vrot.slane %v1497_v2, 1 }
 0x1ef   : > { %v1499_v44 = vadd.f32 %v1498_v4, %v1497_v2 }
 0x1f1   : > { %v1501_v29 = vmax.f32 %v1499_v44, 1e-24 }
 0x1f3   : > { %1732 = vrsqrt.f32 %v1501_v29  ;;  %vm1518_vm5 = vweird.f32 %v1501_v29 }
 0x1f9   : > { %v1733_v16 = vpop.eup %1732 }
 0x1fa   : > { %v1513_v56 = vmul.f32 %v1733_v16, %v1501_v29  ;;  %vm1519_vm4 = vweird.f32 %v1733_v16 }
 0x1fb   : > { %vm1520_vm6 = vmor %vm1518_vm5, %vm1519_vm4 }
 0x1fc   : > { %v1514_v30 = vmul.f32 %v1733_v16, %v1513_v56 }
 0x1fe   : > { %v1515_v31 = vmul.f32 0.5, %v1514_v30 }
 0x200   : > { %v1516_v34 = vsub.f32 1.5, %v1515_v31 }
 0x202   : > { %v1517_v18 = vmul.f32 %v1733_v16, %v1516_v34 }
 0x204   : > { %v1521_v37 = vsel %vm1520_vm6, %v1733_v16, %v1517_v18 }
 0x205   : > { %v1523_v42 = vmul.f32 %v1521_v37, %v1460_v11  ;;  %v1525_v43 = vmul.f32 %v1521_v37, %v1464_v9  ;;  %v1527_v45 = vmul.f32 %v1521_v37, %v1468_v41  ;;  %v1529_v32 = vmul.f32 %v1521_v37, %v1472_v40 }
 0x207   : > { %1531 = vst [vmem:[%s2408_s16 + $0x8] sm:$0xff] %v1523_v42 }
 0x208   : > { %1533 = vst [vmem:[%s2408_s16 + $0x18] sm:$0xff] %v1525_v43 }
 0x209   : > { %1535 = vst [vmem:[%s2408_s16 + $0x28] sm:$0xff] %v1527_v45 }
 0x20a   : > { %1537 = vst [vmem:[%s2408_s16 + $0x38] sm:$0xff] %v1529_v32 }
 0x20b   : > { %1791 = shalt.err (!%p1788_p13)
}
 0x20c   : > { %s1851_s29 = smov 256   ;;  %s1852_s16 = smov 16  }
 0x20d   : > { %1662 = dma.vmem_to_hbm [thread:$0]  (%p1934_p9), %s1554_s27, 1024, %s1556_s11, %s1539_s21, %s1851_s29, %s1851_s29, %s1852_s16  }
 0x20e PF: > { %s1570_s10 = sand.u32 1, %s1826_s18   ;;  %p1669_p0 = pnand %p1646_p12, %p1941_p11 }
 0x20f   : > { %s1571_s17 = scalar_lea.sflag [#allocation4], %s1570_s10 }
 0x210   : > { %p1670_p1 = pneg %p1669_p0 }
 0x212   : > { %1821 = dma.done.wait (%p1670_p1), %s1571_s17, 1024  }
 0x213   : > { %1823 = vsyncadd (%p1670_p1), %s1571_s17, 4294966272  ;;  %s21_s23 = sadd.s32 1, %s1846_s23   ;;  %s2467_s18 = smov %s1830_s19 }
 0x214   : > { %p18_p2 = scmp.ge.s32.totalorder %s21_s23, 4   ;;  %s2468_s19 = smov %s1834_s20 }
 0x215   : > { %s2469_s20 = smov %s1939_s7  ;;  %s2470_s21 = smov %s1842_s22 }
 0x216   : > { %s2471_s22 = smov %s2473_s26  ;;  %20 = sbr.rel (!%p18_p2) target bundleno = 6 (0x6), region = 85 }
 0x21b   :  { %1577 = vsyncpa [#allocation3], 1 }
 0x21c   :  { %1579 = vsyncpa [#allocation3 + $0x1], 1 }
 0x21d   :  { %1580 = vsyncpa [#allocation4], 1 }
 0x21e   :  { %1582 = vsyncpa [#allocation4 + $0x1], 1 }

</bundles_post_ra>
